<compile_context>
chip_gen: v7x
topology: tpu7x:2x2x1
jax: 0.10.0
libtpu: 0.0.40
codegen_flags: <defaults>
</compile_context>

<pallas_src>
import numpy as np
import jax
import jax.numpy as jnp
from jax.experimental import pallas as pl
from jax.experimental.pallas import tpu as pltpu


# --------------------------------------------------------------------------- #
# Kernel body: one (TN patients) x (TT time steps) tile.
#   lam_ref  : (TN, K, TT)    phip_ref : (K, D, TT)   (already sigmoid'ed)
#   pi_ref   : (TN, D, TT)    theta_ref: (TN, K, TT)
# --------------------------------------------------------------------------- #
def _forward_kernel(lam_ref, phip_ref, pi_ref, theta_ref):
    lam = lam_ref[...]                                   # (TN, K, TT) f32
    phip = phip_ref[...]                                 # (K,  D, TT) f32
    K = lam.shape[1]

    # softmax over topics K (axis=1): sublane reduce (XLU) + exp (EUP),
    # exact normalization (EUP/VALU have slack; avoids ~1e-3 approx error).
    m = jnp.max(lam, axis=1, keepdims=True)              # (TN, 1, TT)
    e = jnp.exp(lam - m)                                  # (TN, K, TT)
    s = jnp.sum(e, axis=1, keepdims=True)                 # (TN, 1, TT)
    theta = e / s
    theta_ref[...] = theta

    # pi[n,d,t] = sum_k theta[n,k,t] * phip[k,d,t]
    # K is small -> unrolled VPU broadcast-FMA (MXU would pad K to 128/256 and
    # force layout shuffles).  Two interleaved accumulators break the serial
    # mul+add dependence chain (no f32 FMA on v5e/v6e).
    def term(k):
        return theta[:, k:k + 1, :] * phip[k:k + 1, :, :]     # (TN, D, TT)

    acc0 = term(0)
    acc1 = term(1) if K > 1 else None
    for k in range(2, K, 2):
        acc0 = acc0 + term(k)
        if k + 1 < K:
            acc1 = acc1 + term(k + 1)
    pi_ref[...] = acc0 if acc1 is None else acc0 + acc1


# --------------------------------------------------------------------------- #
# Tiling / VMEM helpers (account for (8,128) sublane/lane padding).
# --------------------------------------------------------------------------- #
def _vmem_budget_bytes():
    """~3/4 of physical VMEM: ~96 MiB on v5e/v6e, ~48 MiB on v7x."""
    try:
        cap = int(pltpu.get_tpu_info().vmem_capacity_bytes)
        return max(32 << 20, (cap * 3) // 4)
    except Exception:
        return 48 << 20  # conservative: safe on v5e / v6e / v7x


def _round_up(x, m):
    return ((int(x) + m - 1) // m) * m


def _block_bytes(lead, sub, lane, itemsize=4):
    """VMEM footprint of one (lead, sub, lane) f32 block incl. (8,128) padding."""
    return lead * _round_up(max(sub, 1), 8) * _round_up(max(lane, 1), 128) * itemsize


def _working_set_bytes(tn, K, D, tt):
    lam = _block_bytes(tn, K, tt)        # lambda block
    theta = _block_bytes(tn, K, tt)      # theta block
    phip = _block_bytes(K, D, tt)        # phi_prob block
    pi = _block_bytes(tn, D, tt)         # pi block
    return 2 * (lam + theta + phip + pi)  # x2: double-buffered pipeline


def _auto_tiles(N, K, D, T, vmem_budget):
    # Time (lane) tile: lane-dense multiple of 128 when T is large enough that
    # padding costs less than masked/short rows; otherwise take the full T.
    if T >= 64:
        tt = min(_round_up(T, 128), 512)
    else:
        tt = T
    tn = min(_round_up(N, 8), 512)        # patient (leading) tile, sublane-dense

    budget = int(vmem_budget * 0.9)
    while _working_set_bytes(tn, K, D, tt) > budget:
        if tn > 8:
            tn = max(8, (tn // 16) * 8)          # halve, keep multiple of 8
        elif tt > 128:
            tt = max(128, (tt // 256) * 128)     # halve, keep multiple of 128
        else:
            break  # TODO(synk): tile the disease axis D for extremely large D
    return tn, tt


# --------------------------------------------------------------------------- #
# Wrapper
# --------------------------------------------------------------------------- #
def aladyn_forward(lambda_, phi, *, tn=None, tt=None):
    """lambda_: (N, K, T), phi: (K, D, T).
       Returns (pi (N,D,T), theta (N,K,T), phi_prob (K,D,T)) exactly like
       AladynSurvivalModel.forward()."""
    N, K, T = lambda_.shape
    K2, D, T2 = phi.shape
    assert K == K2 and T == T2

    lam = lambda_.astype(jnp.float32)
    # Hoisted: one sigmoid pass over K*D*T (was recomputed per patient tile).
    phi_prob = jax.nn.sigmoid(phi.astype(jnp.float32))

    vmem_limit = _vmem_budget_bytes()
    auto_tn, auto_tt = _auto_tiles(N, K, D, T, vmem_limit)
    TN = _round_up(tn, 8) if tn is not None else auto_tn
    TT = int(tt) if tt is not None else auto_tt
    if TT < T:
        assert TT % 128 == 0, "time tile must be a multiple of 128 unless it covers all of T"

    # Pad to tile multiples (outputs sliced back). Zero padding is safe: padded
    # rows/columns only produce values that are discarded after the call.
    N_pad = _round_up(N, TN)
    T_pad = _round_up(T, TT)
    lam_in = lam
    if (N_pad, T_pad) != (N, T):
        lam_in = jnp.pad(lam, ((0, N_pad - N), (0, 0), (0, T_pad - T)))
    phip_in = phi_prob
    if T_pad != T:
        phip_in = jnp.pad(phi_prob, ((0, 0), (0, 0), (0, T_pad - T)))

    grid = (T_pad // TT, N_pad // TN)   # (time tiles, patient tiles), both parallel

    cost = pl.CostEstimate(
        flops=2 * N_pad * K * D * T_pad + 5 * N_pad * K * T_pad,
        transcendentals=N_pad * K * T_pad,
        bytes_accessed=4 * (2 * N_pad * K * T_pad + N_pad * D * T_pad
                            + K * D * T_pad * (N_pad // TN)),
    )

    pi_p, theta_p = pl.pallas_call(
        _forward_kernel,
        out_shape=(
            jax.ShapeDtypeStruct((N_pad, D, T_pad), jnp.float32),   # pi
            jax.ShapeDtypeStruct((N_pad, K, T_pad), jnp.float32),   # theta
        ),
        grid_spec=pltpu.PrefetchScalarGridSpec(
            num_scalar_prefetch=0,
            grid=grid,
            in_specs=[
                pl.BlockSpec((TN, K, TT), lambda t, n: (n, 0, t)),   # lambda_
                pl.BlockSpec((K, D, TT), lambda t, n: (0, 0, t)),    # phi_prob
            ],
            out_specs=[
                pl.BlockSpec((TN, D, TT), lambda t, n: (n, 0, t)),   # pi
                pl.BlockSpec((TN, K, TT), lambda t, n: (n, 0, t)),   # theta
            ],
        ),
        compiler_params=pltpu.CompilerParams(
            dimension_semantics=("parallel", "parallel"),
            vmem_limit_bytes=int(vmem_limit),
        ),
        cost_estimate=cost,
    )(lam_in, phip_in)

    pi = pi_p[:N, :, :T]
    theta = theta_p[:N, :, :T]
    return pi, theta, phi_prob


# --------------------------------------------------------------------------- #
# Reference (plain JAX) for checking
# --------------------------------------------------------------------------- #
def _reference(lambda_, phi):
    theta = jax.nn.softmax(lambda_, axis=1)
    phip = jax.nn.sigmoid(phi)
    pi = jnp.einsum('nkt,kdt->ndt', theta, phip)
    return pi, theta, phip


# --------------------------------------------------------------------------- #
# Self-contained test
# --------------------------------------------------------------------------- #
if __name__ == "__main__":
    # ---------------- Test 1: module-style deterministic init ---------------- #
    N, D, T, K, P = 8, 16, 8, 4, 5

    key = jax.random.PRNGKey(0)
    k1, k2, k3, k4, k5, k6, k7 = jax.random.split(key, 7)

    # Synthetic data (as passed into __init__)
    G = jax.random.normal(k1, (N, P), dtype=jnp.float32)
    Y = (jax.random.uniform(k2, (N, D, T)) < 0.3).astype(jnp.float32)
    prevalence_t = jax.random.uniform(k3, (D, T), minval=0.05, maxval=0.5,
                                      dtype=jnp.float32)
    eps = 1e-8
    logit_prev_t = jnp.log((prevalence_t + eps) / (1.0 - prevalence_t + eps))

    # ---- deterministic parameter init (mirrors initialize_params) ----
    Y_avg = np.asarray(jnp.mean(Y, axis=2), dtype=np.float64)          # (N, D)
    U, S, Vh = np.linalg.svd(Y_avg, full_matrices=False)
    lambda_init = U[:, :K] @ np.diag(np.sqrt(S[:K]))                   # (N, K)
    Gn = np.asarray(G, dtype=np.float64)
    gamma, *_ = np.linalg.lstsq(Gn, lambda_init, rcond=None)           # (P, K)
    lambda_means = Gn @ gamma                                          # (N, K)

    # GP kernel at init (length_scale = T/3 clamped, amplitude = exp(0) = 1)
    times = np.arange(T, dtype=np.float64)
    sq_dists = (times[None, :] - times[:, None]) ** 2
    ls = float(np.clip(T / 3.0, max(1.0, T / 20.0), T / 2.0))
    amp = 1.0
    jitter = 1e-4  # TODO(synk): torch code doubles jitter until cond<1e4; fixed jitter used here
    Kmat = amp ** 2 * np.exp(-0.5 * sq_dists / ls ** 2) + jitter * np.eye(T)
    L = np.linalg.cholesky(Kmat)                                       # (T, T)

    noise_l = np.asarray(jax.random.normal(k4, (N, K, T)), dtype=np.float64)
    noise_p = np.asarray(jax.random.normal(k5, (K, D, T)), dtype=np.float64)
    logit_prev_np = np.asarray(logit_prev_t, dtype=np.float64)

    lambda_np = np.zeros((N, K, T), dtype=np.float64)
    phi_np = np.zeros((K, D, T), dtype=np.float64)
    for kk in range(K):
        for i in range(N):
            lambda_np[i, kk, :] = lambda_means[i, kk] + L @ noise_l[i, kk]
        for d in range(D):
            phi_np[kk, d, :] = logit_prev_np[d, :] + L @ noise_p[kk, d]

    lambda_ = jnp.asarray(lambda_np, dtype=jnp.float32)   # (N, K, T)
    phi = jnp.asarray(phi_np, dtype=jnp.float32)          # (K, D, T)

    pi, theta, phi_prob = jax.block_until_ready(aladyn_forward(lambda_, phi))
    pi_r, theta_r, phip_r = _reference(lambda_, phi)

    np.testing.assert_allclose(np.asarray(phi_prob), np.asarray(phip_r),
                               atol=1e-5, rtol=1e-5)
    np.testing.assert_allclose(np.asarray(theta), np.asarray(theta_r),
                               atol=1e-5, rtol=1e-5)
    np.testing.assert_allclose(np.asarray(pi), np.asarray(pi_r),
                               atol=1e-5, rtol=1e-5)

    # ------- Test 2: padding + multi-tile path (awkward N, T > 128) -------- #
    N2, K2, D2, T2 = 20, 4, 16, 130      # N not a multiple of 8, T not of 128
    lam2 = jax.random.normal(k6, (N2, K2, T2), dtype=jnp.float32)
    phi2 = jax.random.normal(k7, (K2, D2, T2), dtype=jnp.float32)

    pi2, theta2, phip2 = jax.block_until_ready(
        aladyn_forward(lam2, phi2, tn=8, tt=128))   # 3 patient tiles, 2 time tiles
    pi2_r, theta2_r, phip2_r = _reference(lam2, phi2)

    np.testing.assert_allclose(np.asarray(phip2), np.asarray(phip2_r),
                               atol=1e-5, rtol=1e-5)
    np.testing.assert_allclose(np.asarray(theta2), np.asarray(theta2_r),
                               atol=1e-5, rtol=1e-5)
    np.testing.assert_allclose(np.asarray(pi2), np.asarray(pi2_r),
                               atol=1e-5, rtol=1e-5)

    print("KERNEL_OK")
</pallas_src>

<mosaic_0001>
module attributes {stable_mosaic.version = 11 : i64} {
  func.func @_forward_kernel(%arg0: i32, %arg1: i32, %arg2: memref<8x4x8xf32, #tpu.memory_space<vmem>>, %arg3: memref<4x16x8xf32, #tpu.memory_space<vmem>>, %arg4: memref<8x16x8xf32, #tpu.memory_space<vmem>>, %arg5: memref<8x4x8xf32, #tpu.memory_space<vmem>>) attributes {dimension_semantics = [#tpu.dimension_semantics<parallel>, #tpu.dimension_semantics<parallel>], iteration_bounds = array<i64: 1, 1>, scalar_prefetch = 0 : i64, scratch_operands = 0 : i64, tpu.core_type = #tpu.core_type<tc>, window_params = [{transform_indices = @transform_0, window_bounds = array<i64: 8, 4, 8>}, {transform_indices = @transform_1, window_bounds = array<i64: 4, 16, 8>}, {transform_indices = @transform_2, window_bounds = array<i64: 8, 16, 8>}, {transform_indices = @transform_3, window_bounds = array<i64: 8, 4, 8>}]} {
    %c0 = arith.constant 0 : index
    %c0_0 = arith.constant 0 : index
    %c0_1 = arith.constant 0 : index
    %0 = vector.load %arg2[%c0, %c0_0, %c0_1] : memref<8x4x8xf32, #tpu.memory_space<vmem>>, vector<8x4x8xf32>
    %c0_2 = arith.constant 0 : index
    %c0_3 = arith.constant 0 : index
    %c0_4 = arith.constant 0 : index
    %1 = vector.load %arg3[%c0_2, %c0_3, %c0_4] : memref<4x16x8xf32, #tpu.memory_space<vmem>>, vector<4x16x8xf32>
    %cst = arith.constant dense<0xFF800000> : vector<8x8xf32>
    %2 = vector.multi_reduction <maximumf>, %0, %cst [1] : vector<8x4x8xf32> to vector<8x8xf32>
    %3 = vector.shape_cast %2 : vector<8x8xf32> to vector<8x1x8xf32>
    %4 = vector.broadcast %3 : vector<8x1x8xf32> to vector<8x4x8xf32>
    %5 = arith.subf %0, %4 : vector<8x4x8xf32>
    %6 = math.exp %5 : vector<8x4x8xf32>
    %cst_5 = arith.constant dense<0.000000e+00> : vector<8x8xf32>
    %7 = vector.multi_reduction <add>, %6, %cst_5 [1] : vector<8x4x8xf32> to vector<8x8xf32>
    %8 = vector.shape_cast %7 : vector<8x8xf32> to vector<8x1x8xf32>
    %9 = vector.broadcast %8 : vector<8x1x8xf32> to vector<8x4x8xf32>
    %10 = arith.divf %6, %9 : vector<8x4x8xf32>
    %c0_6 = arith.constant 0 : index
    %c0_7 = arith.constant 0 : index
    %c0_8 = arith.constant 0 : index
    %11 = vector.load %arg5[%c0_6, %c0_7, %c0_8] : memref<8x4x8xf32, #tpu.memory_space<vmem>>, vector<8x4x8xf32>
    tpu.vector_store %arg5[%c0_6, %c0_7, %c0_8], %10 {strides = array<i32>} : memref<8x4x8xf32, #tpu.memory_space<vmem>>, vector<8x4x8xf32>,
    %12 = vector.extract_strided_slice %10 {offsets = [0, 0, 0], sizes = [8, 1, 8], strides = [1, 1, 1]} : vector<8x4x8xf32> to vector<8x1x8xf32>
    %13 = vector.extract_strided_slice %1 {offsets = [0, 0, 0], sizes = [1, 16, 8], strides = [1, 1, 1]} : vector<4x16x8xf32> to vector<1x16x8xf32>
    %14 = vector.broadcast %12 : vector<8x1x8xf32> to vector<8x16x8xf32>
    %15 = vector.broadcast %13 : vector<1x16x8xf32> to vector<8x16x8xf32>
    %16 = arith.mulf %14, %15 : vector<8x16x8xf32>
    %17 = vector.extract_strided_slice %10 {offsets = [0, 1, 0], sizes = [8, 1, 8], strides = [1, 1, 1]} : vector<8x4x8xf32> to vector<8x1x8xf32>
    %18 = vector.extract_strided_slice %1 {offsets = [1, 0, 0], sizes = [1, 16, 8], strides = [1, 1, 1]} : vector<4x16x8xf32> to vector<1x16x8xf32>
    %19 = vector.broadcast %17 : vector<8x1x8xf32> to vector<8x16x8xf32>
    %20 = vector.broadcast %18 : vector<1x16x8xf32> to vector<8x16x8xf32>
    %21 = arith.mulf %19, %20 : vector<8x16x8xf32>
    %22 = vector.extract_strided_slice %10 {offsets = [0, 2, 0], sizes = [8, 1, 8], strides = [1, 1, 1]} : vector<8x4x8xf32> to vector<8x1x8xf32>
    %23 = vector.extract_strided_slice %1 {offsets = [2, 0, 0], sizes = [1, 16, 8], strides = [1, 1, 1]} : vector<4x16x8xf32> to vector<1x16x8xf32>
    %24 = vector.broadcast %22 : vector<8x1x8xf32> to vector<8x16x8xf32>
    %25 = vector.broadcast %23 : vector<1x16x8xf32> to vector<8x16x8xf32>
    %26 = arith.mulf %24, %25 : vector<8x16x8xf32>
    %27 = arith.addf %16, %26 : vector<8x16x8xf32>
    %28 = vector.extract_strided_slice %10 {offsets = [0, 3, 0], sizes = [8, 1, 8], strides = [1, 1, 1]} : vector<8x4x8xf32> to vector<8x1x8xf32>
    %29 = vector.extract_strided_slice %1 {offsets = [3, 0, 0], sizes = [1, 16, 8], strides = [1, 1, 1]} : vector<4x16x8xf32> to vector<1x16x8xf32>
    %30 = vector.broadcast %28 : vector<8x1x8xf32> to vector<8x16x8xf32>
    %31 = vector.broadcast %29 : vector<1x16x8xf32> to vector<8x16x8xf32>
    %32 = arith.mulf %30, %31 : vector<8x16x8xf32>
    %33 = arith.addf %21, %32 : vector<8x16x8xf32>
    %34 = arith.addf %27, %33 : vector<8x16x8xf32>
    %c0_9 = arith.constant 0 : index
    %c0_10 = arith.constant 0 : index
    %c0_11 = arith.constant 0 : index
    %35 = vector.load %arg4[%c0_9, %c0_10, %c0_11] : memref<8x16x8xf32, #tpu.memory_space<vmem>>, vector<8x16x8xf32>
    tpu.vector_store %arg4[%c0_9, %c0_10, %c0_11], %34 {strides = array<i32>} : memref<8x16x8xf32, #tpu.memory_space<vmem>>, vector<8x16x8xf32>,
    return
  }
  func.func @transform_0(%arg0: i32, %arg1: i32) -> (i32, i32, i32) {
    %c0_i32 = arith.constant 0 : i32
    %c0_i32_0 = arith.constant 0 : i32
    return %arg1, %c0_i32, %arg0 : i32, i32, i32
  }
  func.func @transform_1(%arg0: i32, %arg1: i32) -> (i32, i32, i32) {
    %c0_i32 = arith.constant 0 : i32
    %c0_i32_0 = arith.constant 0 : i32
    %c0_i32_1 = arith.constant 0 : i32
    return %c0_i32, %c0_i32_0, %arg0 : i32, i32, i32
  }
  func.func @transform_2(%arg0: i32, %arg1: i32) -> (i32, i32, i32) {
    %c0_i32 = arith.constant 0 : i32
    %c0_i32_0 = arith.constant 0 : i32
    return %arg1, %c0_i32, %arg0 : i32, i32, i32
  }
  func.func @transform_3(%arg0: i32, %arg1: i32) -> (i32, i32, i32) {
    %c0_i32 = arith.constant 0 : i32
    %c0_i32_0 = arith.constant 0 : i32
    return %arg1, %c0_i32, %arg0 : i32, i32, i32
  }
}

</mosaic_0001>

<bundles_post_ra>
// kernel: tpu_custom_call.1
= control target key start
LH: loop header
LB: loop body
LE: loop exit
PB: predicated region body
PF: predicated region fallthrough
CT: control target
= control target key end

     0   :  { %vm30_vm0 = vcmask 60416   ;;  %s927_s0 = inlined_call_operand.vmem [shape: f32[8,4,8], index: 0, kind: input, shape index: {}]   ;;  %s928_s1 = inlined_call_operand.vmem [shape: f32[4,16,8], index: 1, kind: input, shape index: {}]   ;;  %s929_s2 = inlined_call_operand.vmem [shape: f32[8,16,8], index: 2, kind: output, shape index: {0}]   ;;  %s930_s3 = inlined_call_operand.hbm [shape: f32[8,4,8], index: 3, kind: output, shape index: {1}]  }
   0x1   :  { %v553_v0 = vld [vmem:[%s927_s0] sm:$0xf]  ;;  %v558_v1 = vld [vmem:[%s927_s0 + $0x4] sm:$0xf]  ;;  %v567_v4 = vld [vmem:[%s927_s0 + $0x8] sm:$0xf] }
   0x2   :  { %v31_v2 = vsel %vm30_vm0, %v553_v0, -inf  ;;  %v38_v3 = vsel %vm30_vm0, %v558_v1, -inf  ;;  %v572_v5 = vld [vmem:[%s927_s0 + $0xc] sm:$0xf]  ;;  %v45_v8 = vsel %vm30_vm0, %v567_v4, -inf }
   0x3   :  { %v32_v6 = vrot.slane %v31_v2, 4  ;;  %v39_v7 = vrot.slane %v38_v3, 4  ;;  %v52_v9 = vsel %vm30_vm0, %v572_v5, -inf  ;;  %v581_v10 = vld [vmem:[%s927_s0 + $0x10] sm:$0xf]  ;;  %v46_v11 = vrot.slane %v45_v8, 4 }
   0x4   :  { %v53_v12 = vrot.slane %v52_v9, 4  ;;  %v59_v13 = vsel %vm30_vm0, %v581_v10, -inf  ;;  %v588_v14 = vld [vmem:[%s927_s0 + $0x14] sm:$0xf]  ;;  %v20_v19 = vld [vmem:[%s927_s0 + $0x18] sm:$0xf] }
   0x5   :  { %v33_v15 = vmax.f32 %v31_v2, %v32_v6  ;;  %v40_v16 = vmax.f32 %v38_v3, %v39_v7  ;;  %v60_v17 = vrot.slane %v59_v13, 4  ;;  %v66_v18 = vsel %vm30_vm0, %v588_v14, -inf  ;;  %v598_v20 = vld [vmem:[%s927_s0 + $0x1c] sm:$0xf] }
   0x6   :  { %v47_v21 = vmax.f32 %v45_v8, %v46_v11  ;;  %v54_v22 = vmax.f32 %v52_v9, %v53_v12  ;;  %v67_v23 = vrot.slane %v66_v18, 4  ;;  %v73_v24 = vsel %vm30_vm0, %v20_v19, -inf }
   0x7   :  { %v34_v25 = vrot.slane %v33_v15, 2  ;;  %v41_v26 = vrot.slane %v40_v16, 2  ;;  %v61_v27 = vmax.f32 %v59_v13, %v60_v17  ;;  %v74_v28 = vrot.slane %v73_v24, 4 }
   0x8   :  { %v48_v29 = vrot.slane %v47_v21, 2  ;;  %v55_v30 = vrot.slane %v54_v22, 2  ;;  %v68_v31 = vmax.f32 %v66_v18, %v67_v23  ;;  %v80_v32 = vsel %vm30_vm0, %v598_v20, -inf }
   0x9   :  { %9 = vsyncpa [#allocation3], 0  ;;  %v35_v33 = vmax.f32 %v33_v15, %v34_v25  ;;  %v42_v34 = vmax.f32 %v40_v16, %v41_v26  ;;  %v62_v35 = vrot.slane %v61_v27, 2  ;;  %v75_v36 = vmax.f32 %v73_v24, %v74_v28 }
   0xa   :  { %v49_v37 = vmax.f32 %v47_v21, %v48_v29  ;;  %v56_v38 = vmax.f32 %v54_v22, %v55_v30  ;;  %v69_v39 = vrot.slane %v68_v31, 2  ;;  %v81_v40 = vrot.slane %v80_v32, 4 }
   0xb   :  { %v36_v41 = vrot.slane %v35_v33, 1  ;;  %v43_v42 = vrot.slane %v42_v34, 1  ;;  %v63_v43 = vmax.f32 %v61_v27, %v62_v35  ;;  %v76_v44 = vrot.slane %v75_v36, 2 }
   0xc   :  { %v50_v45 = vrot.slane %v49_v37, 1  ;;  %v57_v46 = vrot.slane %v56_v38, 1  ;;  %v70_v47 = vmax.f32 %v68_v31, %v69_v39  ;;  %v82_v48 = vmax.f32 %v80_v32, %v81_v40 }
   0xd   :  { %v37_v49 = vmax.f32 %v35_v33, %v36_v41  ;;  %v44_v50 = vmax.f32 %v42_v34, %v43_v42  ;;  %v64_v51 = vrot.slane %v63_v43, 1  ;;  %v77_v52 = vmax.f32 %v75_v36, %v76_v44 }
   0xe   :  { %v51_v53 = vmax.f32 %v49_v37, %v50_v45  ;;  %v58_v54 = vmax.f32 %v56_v38, %v57_v46  ;;  %v71_v55 = vrot.slane %v70_v47, 1  ;;  %v83_v56 = vrot.slane %v82_v48, 2 }
   0xf   :  { %v87_v57 = vsub.f32 %v553_v0, %v37_v49  ;;  %v88_v58 = vsub.f32 %v558_v1, %v44_v50  ;;  %v65_v59 = vmax.f32 %v63_v43, %v64_v51  ;;  %v78_v60 = vrot.slane %v77_v52, 1 }
  0x10   :  { %v89_v61 = vsub.f32 %v567_v4, %v51_v53  ;;  %v90_v62 = vsub.f32 %v572_v5, %v58_v54  ;;  %v72_v63 = vmax.f32 %v70_v47, %v71_v55  ;;  %v84_v2 = vmax.f32 %v82_v48, %v83_v56 }
  0x11   :  { %v95_v3 = vmul.f32 1.442695, %v87_v57  ;;  %v97_v6 = vmul.f32 1.442695, %v88_v58  ;;  %v91_v7 = vsub.f32 %v581_v10, %v65_v59  ;;  %v79_v8 = vmax.f32 %v77_v52, %v78_v60 }
  0x12   :  { %v99_v9 = vmul.f32 1.442695, %v89_v61  ;;  %v101_v11 = vmul.f32 1.442695, %v90_v62  ;;  %v92_v12 = vsub.f32 %v588_v14, %v72_v63  ;;  %v85_v0 = vrot.slane %v84_v2, 1 }
  0x13   :  { %471 = vpow2.f32 %v95_v3  ;;  %v103_v1 = vmul.f32 1.442695, %v91_v7  ;;  %v93_v13 = vsub.f32 %v20_v19, %v79_v8  ;;  %v191_v33 = vlaneseq }
  0x14   :  { %473 = vpow2.f32 %v97_v6  ;;  %v105_v15 = vmul.f32 1.442695, %v92_v12  ;;  %v86_v4 = vmax.f32 %v84_v2, %v85_v0  ;;  %vm431_vm1 = vcmask 64512  }
  0x15   :  { %475 = vpow2.f32 %v99_v9  ;;  %v107_v5 = vmul.f32 1.442695, %v93_v13 }
  0x16   :  { %477 = vpow2.f32 %v101_v11  ;;  %v94_v16 = vsub.f32 %v598_v20, %v86_v4 }
  0x17   :  { %479 = vpow2.f32 %v103_v1 }
  0x18   :  { %481 = vpow2.f32 %v105_v15  ;;  %v109_v10 = vmul.f32 1.442695, %v94_v16 }
  0x19   :  { %483 = vpow2.f32 %v107_v5 }
  0x1a   :  { %485 = vpow2.f32 %v109_v10 }
  0x1d   :  { %v610_v17 = vpop.eup %471 }
  0x1e   :  { %v612_v14 = vpop.eup %473  ;;  %v111_v18 = vsel %vm30_vm0, %v610_v17, 0.0 }
  0x1f   :  { %v616_v19 = vpop.eup %475  ;;  %v112_v21 = vrot.slane %v111_v18, 4  ;;  %v118_v22 = vsel %vm30_vm0, %v612_v14, 0.0 }
  0x20   :  { %v620_v23 = vpop.eup %477  ;;  %v119_v20 = vrot.slane %v118_v22, 4  ;;  %v125_v24 = vsel %vm30_vm0, %v616_v19, 0.0 }
  0x21   :  { %v624_v25 = vpop.eup %479  ;;  %v113_v26 = vadd.f32 %v112_v21, %v111_v18  ;;  %v126_v27 = vrot.slane %v125_v24, 4  ;;  %v132_v28 = vsel %vm30_vm0, %v620_v23, 0.0  ;;  %v192_v18 = vshrl.u32 %v191_v33, 7  ;;  %v655_v33 = vld [vmem:[%s928_s1] sm:$0xff] }
  0x22   :  { %v628_v29 = vpop.eup %481  ;;  %v120_v30 = vadd.f32 %v119_v20, %v118_v22  ;;  %v133_v31 = vrot.slane %v132_v28, 4  ;;  %v139_v32 = vsel %vm30_vm0, %v624_v25, 0.0 }
  0x23   :  { %v632_v34 = vpop.eup %483  ;;  %v114_v35 = vrot.slane %v113_v26, 2  ;;  %v127_v36 = vadd.f32 %v126_v27, %v125_v24  ;;  %v140_v37 = vrot.slane %v139_v32, 4  ;;  %v146_v38 = vsel %vm30_vm0, %v628_v29, 0.0 }
  0x24   :  { %v636_v39 = vpop.eup %485  ;;  %v121_v40 = vrot.slane %v120_v30, 2  ;;  %v134_v41 = vadd.f32 %v133_v31, %v132_v28  ;;  %v147_v42 = vrot.slane %v146_v38, 4  ;;  %v153_v43 = vsel %vm30_vm0, %v632_v34, 0.0 }
  0x25   :  { %v115_v44 = vadd.f32 %v114_v35, %v113_v26  ;;  %v128_v45 = vrot.slane %v127_v36, 2  ;;  %v141_v46 = vadd.f32 %v140_v37, %v139_v32  ;;  %v154_v47 = vrot.slane %v153_v43, 4  ;;  %v660_v35 = vld [vmem:[%s928_s1 + $0x10] sm:$0xff] }
  0x26   :  { %v122_v48 = vadd.f32 %v121_v40, %v120_v30  ;;  %v135_v49 = vrot.slane %v134_v41, 2  ;;  %v148_v50 = vadd.f32 %v147_v42, %v146_v38  ;;  %v160_v51 = vsel %vm30_vm0, %v636_v39, 0.0  ;;  %v674_v37 = vld [vmem:[%s928_s1 + $0x30] sm:$0xff]  ;;  %v682_v42 = vld [vmem:[%s928_s1 + $0x8] sm:$0xff] }
  0x27   :  { %v116_v52 = vrot.slane %v115_v44, 1  ;;  %v129_v53 = vadd.f32 %v128_v45, %v127_v36  ;;  %v142_v54 = vrot.slane %v141_v46, 2  ;;  %v155_v55 = vadd.f32 %v154_v47, %v153_v43  ;;  %v665_v36 = vld [vmem:[%s928_s1 + $0x20] sm:$0xff]  ;;  %v702_v47 = vld [vmem:[%s928_s1 + $0x38] sm:$0xff] }
  0x28   :  { %v123_v56 = vrot.slane %v122_v48, 1  ;;  %v136_v57 = vadd.f32 %v135_v49, %v134_v41  ;;  %v149_v58 = vrot.slane %v148_v50, 2  ;;  %v161_v59 = vrot.slane %v160_v51, 4 }
  0x29   :  { %v117_v60 = vadd.f32 %v116_v52, %v115_v44  ;;  %v130_v61 = vrot.slane %v129_v53, 1  ;;  %v143_v62 = vadd.f32 %v142_v54, %v141_v46  ;;  %v156_v63 = vrot.slane %v155_v55, 2  ;;  %v697_v46 = vld [vmem:[%s928_s1 + $0x28] sm:$0xff] }
  0x2a   :  { %v124_v2 = vadd.f32 %v123_v56, %v122_v48  ;;  %v137_v3 = vrot.slane %v136_v57, 1  ;;  %v150_v6 = vadd.f32 %v149_v58, %v148_v50  ;;  %v162_v7 = vadd.f32 %v161_v59, %v160_v51 }
  0x2b   :  { %487 = vrcp.f32 %v117_v60  ;;  %v131_v8 = vadd.f32 %v130_v61, %v129_v53  ;;  %v144_v9 = vrot.slane %v143_v62, 1  ;;  %v157_v11 = vadd.f32 %v156_v63, %v155_v55 }
  0x2c   :  { %489 = vrcp.f32 %v124_v2  ;;  %v138_v12 = vadd.f32 %v137_v3, %v136_v57  ;;  %v151_v0 = vrot.slane %v150_v6, 1  ;;  %v163_v1 = vrot.slane %v162_v7, 2 }
  0x2d   :  { %491 = vrcp.f32 %v131_v8  ;;  %v145_v13 = vadd.f32 %v144_v9, %v143_v62  ;;  %v158_v15 = vrot.slane %v157_v11, 1  ;;  %v642_v22 = vsub.s32 0, %v192_v18 }
  0x2e   :  { %493 = vrcp.f32 %v138_v12  ;;  %v152_v4 = vadd.f32 %v151_v0, %v150_v6  ;;  %v164_v5 = vadd.f32 %v163_v1, %v162_v7  ;;  %v644_v20 = vsub.s32 1, %v192_v18 }
  0x2f   :  { %495 = vrcp.f32 %v145_v13  ;;  %v159_v16 = vadd.f32 %v158_v15, %v157_v11  ;;  %v646_v24 = vsub.s32 2, %v192_v18  ;;  %v648_v27 = vsub.s32 3, %v192_v18 }
  0x30   :  { %497 = vrcp.f32 %v152_v4  ;;  %v165_v10 = vrot.slane %v164_v5, 1 }
  0x31   :  { %499 = vrcp.f32 %v159_v16 }
  0x32   :  { %v166_v21 = vadd.f32 %v165_v10, %v164_v5 }
  0x34   :  { %501 = vrcp.f32 %v166_v21 }
  0x35   :  { %v488_v26 = vpop.eup %487 }
  0x36   :  { %v490_v28 = vpop.eup %489  ;;  %v168_v30 = vmul.f32 %v488_v26, %v610_v17 }
  0x37   :  { %v492_v31 = vpop.eup %491  ;;  %v170_v32 = vmul.f32 %v490_v28, %v612_v14 }
  0x38   :  { %v494_v17 = vpop.eup %493  ;;  %183 = vst.msk [vmem:[#allocation2] sm:$0xf] %vm30_vm0, %v168_v30  ;;  %v669_v14 = vmul.f32 %v492_v31, %v616_v19  ;;  %v194_v38 = vrot.slane %v168_v30, %v642_v22  ;;  %v242_v40 = vrot.slane %v168_v30, %v644_v20  ;;  %v290_v41 = vrot.slane %v168_v30, %v646_v24  ;;  %v687_v19 = vld [vmem:[%s928_s1 + $0x18] sm:$0xff]  ;;  %s527_s1 = smov [#allocation2]  }
  0x39   :  { %v496_v43 = vpop.eup %495  ;;  %184 = vst.msk [vmem:[#allocation2 + $0x4] sm:$0xf] %vm30_vm0, %v170_v32  ;;  %v691_v44 = vmul.f32 %v494_v17, %v620_v23  ;;  %v354_v45 = vrot.slane %v168_v30, %v648_v27  ;;  %v198_v48 = vrot.slane %v170_v32, %v642_v22  ;;  %v246_v49 = vrot.slane %v170_v32, %v644_v20  ;;  %s455_s16 = sshll.u32 %s527_s1, 4  ;;  %s738_s16 = int_to_ptr.vmem [resolvable:$true] %s455_s16 }
  0x3a   :  { %v498_v50 = vpop.eup %497  ;;  %185 = vst.msk [vmem:[#allocation2 + $0x8] sm:$0xf] %vm30_vm0, %v669_v14  ;;  %v709_v23 = vmul.f32 %v496_v43, %v624_v25  ;;  %v223_v51 = vmul.f32 %v194_v38, %v655_v33  ;;  %v271_v52 = vmul.f32 %v242_v40, %v660_v35  ;;  %v319_v53 = vmul.f32 %v290_v41, %v665_v36  ;;  %s503_s21 = scalar_lea.vmem %s738_s16, 512  ;;  %p508_p1 = scmp.lt.s32.totalorder %s738_s16, %s738_s16 }
  0x3b   :  { %v500_v54 = vpop.eup %499  ;;  %186 = vst.msk [vmem:[#allocation2 + $0xc] sm:$0xf] %vm30_vm0, %v691_v44  ;;  %v717_v55 = vmul.f32 %v498_v50, %v628_v29  ;;  %v383_v56 = vmul.f32 %v354_v45, %v674_v37  ;;  %v224_v57 = vmul.f32 %v194_v38, %v682_v42  ;;  %v272_v25 = vmul.f32 %v242_v40, %v687_v19  ;;  %p504_p0 = scmp.ne.s32.totalorder %s738_s16, %s503_s21  ;;  %p509_p2 = scmp.lt.s32.totalorder %s503_s21, %s503_s21 }
  0x3c   :  { %187 = vst.msk [vmem:[#allocation2 + $0x10] sm:$0xf] %vm30_vm0, %v709_v23  ;;  %v725_v58 = vmul.f32 %v500_v54, %v632_v34  ;;  %v335_v59 = vadd.f32 %v319_v53, %v223_v51  ;;  %v320_v60 = vmul.f32 %v290_v41, %v697_v46  ;;  %v384_v29 = vmul.f32 %v354_v45, %v702_v47 }
  0x3d   :  { %188 = vst.msk [vmem:[#allocation2 + $0x14] sm:$0xf] %vm30_vm0, %v717_v55  ;;  %v399_v61 = vadd.f32 %v383_v56, %v271_v52  ;;  %v225_v62 = vmul.f32 %v198_v48, %v655_v33  ;;  %v273_v63 = vmul.f32 %v246_v49, %v660_v35  ;;  %v294_v2 = vrot.slane %v170_v32, %v646_v24  ;;  %p510_p3 = por %p509_p2, %p508_p1 }
  0x3e   :  { %v502_v3 = vpop.eup %501  ;;  %189 = vst.msk [vmem:[#allocation2 + $0x18] sm:$0xf] %vm30_vm0, %v725_v58  ;;  %v336_v34 = vadd.f32 %v320_v60, %v224_v57  ;;  %v400_v6 = vadd.f32 %v384_v29, %v272_v25  ;;  %v358_v7 = vrot.slane %v170_v32, %v648_v27  ;;  %v226_v8 = vmul.f32 %v198_v48, %v682_v42 }
  0x3f   :  { %v741_v9 = vmul.f32 %v502_v3, %v636_v39  ;;  %v415_v11 = vadd.f32 %v399_v61, %v335_v59  ;;  %v321_v12 = vmul.f32 %v294_v2, %v665_v36  ;;  %v274_v0 = vmul.f32 %v246_v49, %v687_v19  ;;  %p511_p4 = pnand %p510_p3, %p504_p0 }
  0x40   :  { %v416_v1 = vadd.f32 %v400_v6, %v336_v34  ;;  %v385_v13 = vmul.f32 %v358_v7, %v674_v37  ;;  %v322_v15 = vmul.f32 %v294_v2, %v697_v46  ;;  %v386_v4 = vmul.f32 %v358_v7, %v702_v47 }
  0x41   :  { %190 = vst.msk [vmem:[#allocation2 + $0x1c] sm:$0xf] %vm30_vm0, %v741_v9  ;;  %v337_v39 = vadd.f32 %v321_v12, %v225_v62  ;;  %v202_v5 = vrot.slane %v669_v14, %v642_v22  ;;  %v250_v16 = vrot.slane %v669_v14, %v644_v20  ;;  %v298_v10 = vrot.slane %v669_v14, %v646_v24 }
  0x42   :  { %432 = vst.msk [vmem:[%s929_s2] sm:$0xff] %vm431_vm1, %v415_v11  ;;  %433 = vst.msk [vmem:[%s929_s2 + $0x8] sm:$0xff] %vm431_vm1, %v416_v1  ;;  %v401_v18 = vadd.f32 %v385_v13, %v273_v63  ;;  %v338_v21 = vadd.f32 %v322_v15, %v226_v8  ;;  %v402_v26 = vadd.f32 %v386_v4, %v274_v0 }
  0x43   :  { %v362_v28 = vrot.slane %v669_v14, %v648_v27 }
  0x44   :  { %514 = shalt.err (!%p511_p4)
}
  0x45   :  { %s515_s24 = scalar_lea.hbm %s930_s3, 512 }
  0x46   :  { %p516_p5 = scmp.ne.s32.totalorder %s930_s3, %s515_s24  ;;  %p519_p6 = scmp.lt.u32.totalorder %s515_s24, %s930_s3 }
  0x48   :  { %p521_p7 = pnand %p519_p6, %p516_p5 }
  0x4a   :  { %524 = shalt.err (!%p521_p7)
}
  0x4b   :  { %s528_s28 = smov 64   ;;  %s529_s29 = smov 4   ;;  %v227_v30 = vmul.f32 %v202_v5, %v655_v33  ;;  %v275_v31 = vmul.f32 %v250_v16, %v660_v35  ;;  %v323_v32 = vmul.f32 %v298_v10, %v665_v36  ;;  %v228_v17 = vmul.f32 %v202_v5, %v682_v42 }
  0x4c   :  { %461 = dma.vmem_to_hbm [thread:$0]  %s738_s16, 512, %s930_s3, [#allocation3], %s528_s28, %s528_s28, %s529_s29   ;;  %v417_v14 = vadd.f32 %v401_v18, %v337_v39  ;;  %v418_v38 = vadd.f32 %v402_v26, %v338_v21  ;;  %v387_v40 = vmul.f32 %v362_v28, %v674_v37  ;;  %v276_v41 = vmul.f32 %v250_v16, %v687_v19 }
  0x4d   :  { %v339_v43 = vadd.f32 %v323_v32, %v227_v30  ;;  %v324_v45 = vmul.f32 %v298_v10, %v697_v46  ;;  %v388_v48 = vmul.f32 %v362_v28, %v702_v47  ;;  %v206_v49 = vrot.slane %v691_v44, %v642_v22 }
  0x4e   :  { %434 = vst.msk [vmem:[%s929_s2 + $0x10] sm:$0xff] %vm431_vm1, %v417_v14  ;;  %435 = vst.msk [vmem:[%s929_s2 + $0x18] sm:$0xff] %vm431_vm1, %v418_v38  ;;  %v403_v50 = vadd.f32 %v387_v40, %v275_v31  ;;  %v254_v51 = vrot.slane %v691_v44, %v644_v20  ;;  %v302_v52 = vrot.slane %v691_v44, %v646_v24 }
  0x4f   :  { %v366_v53 = vrot.slane %v691_v44, %v648_v27  ;;  %v340_v54 = vadd.f32 %v324_v45, %v228_v17  ;;  %v404_v56 = vadd.f32 %v388_v48, %v276_v41  ;;  %v229_v57 = vmul.f32 %v206_v49, %v655_v33 }
  0x50   :  { %v230_v25 = vmul.f32 %v206_v49, %v682_v42  ;;  %v419_v59 = vadd.f32 %v403_v50, %v339_v43  ;;  %v277_v60 = vmul.f32 %v254_v51, %v660_v35  ;;  %v325_v29 = vmul.f32 %v302_v52, %v665_v36 }
  0x51   :  { %v389_v61 = vmul.f32 %v366_v53, %v674_v37  ;;  %v420_v62 = vadd.f32 %v404_v56, %v340_v54  ;;  %v278_v63 = vmul.f32 %v254_v51, %v687_v19  ;;  %v326_v2 = vmul.f32 %v302_v52, %v697_v46 }
  0x52   :  { %v390_v44 = vmul.f32 %v366_v53, %v702_v47  ;;  %436 = vst.msk [vmem:[%s929_s2 + $0x20] sm:$0xff] %vm431_vm1, %v419_v59  ;;  %v341_v3 = vadd.f32 %v325_v29, %v229_v57  ;;  %v210_v6 = vrot.slane %v709_v23, %v642_v22  ;;  %v258_v7 = vrot.slane %v709_v23, %v644_v20 }
  0x53   :  { %v405_v34 = vadd.f32 %v389_v61, %v277_v60  ;;  %437 = vst.msk [vmem:[%s929_s2 + $0x28] sm:$0xff] %vm431_vm1, %v420_v62  ;;  %v342_v8 = vadd.f32 %v326_v2, %v230_v25  ;;  %v306_v12 = vrot.slane %v709_v23, %v646_v24  ;;  %v370_v0 = vrot.slane %v709_v23, %v648_v27 }
  0x54   :  { %v406_v11 = vadd.f32 %v390_v44, %v278_v63  ;;  %v231_v13 = vmul.f32 %v210_v6, %v655_v33  ;;  %v279_v15 = vmul.f32 %v258_v7, %v660_v35  ;;  %v232_v4 = vmul.f32 %v210_v6, %v682_v42 }
  0x55   :  { %v421_v1 = vadd.f32 %v405_v34, %v341_v3  ;;  %v327_v5 = vmul.f32 %v306_v12, %v665_v36  ;;  %v391_v16 = vmul.f32 %v370_v0, %v674_v37  ;;  %v280_v10 = vmul.f32 %v258_v7, %v687_v19 }
  0x56   :  { %v422_v39 = vadd.f32 %v406_v11, %v342_v8  ;;  %v328_v23 = vmul.f32 %v306_v12, %v697_v46  ;;  %v392_v18 = vmul.f32 %v370_v0, %v702_v47  ;;  %v214_v21 = vrot.slane %v717_v55, %v642_v22 }
  0x57   :  { %438 = vst.msk [vmem:[%s929_s2 + $0x30] sm:$0xff] %vm431_vm1, %v421_v1  ;;  %v262_v26 = vrot.slane %v717_v55, %v644_v20  ;;  %v343_v28 = vadd.f32 %v327_v5, %v231_v13  ;;  %v407_v30 = vadd.f32 %v391_v16, %v279_v15  ;;  %v310_v31 = vrot.slane %v717_v55, %v646_v24 }
  0x58   :  { %439 = vst.msk [vmem:[%s929_s2 + $0x38] sm:$0xff] %vm431_vm1, %v422_v39  ;;  %v374_v32 = vrot.slane %v717_v55, %v648_v27  ;;  %v344_v17 = vadd.f32 %v328_v23, %v232_v4  ;;  %v408_v14 = vadd.f32 %v392_v18, %v280_v10  ;;  %v233_v38 = vmul.f32 %v214_v21, %v655_v33 }
  0x59   :  { %v281_v40 = vmul.f32 %v262_v26, %v660_v35  ;;  %v423_v41 = vadd.f32 %v407_v30, %v343_v28  ;;  %v329_v43 = vmul.f32 %v310_v31, %v665_v36  ;;  %v234_v48 = vmul.f32 %v214_v21, %v682_v42 }
  0x5a   :  { %v393_v45 = vmul.f32 %v374_v32, %v674_v37  ;;  %v424_v49 = vadd.f32 %v408_v14, %v344_v17  ;;  %v282_v50 = vmul.f32 %v262_v26, %v687_v19  ;;  %v330_v51 = vmul.f32 %v310_v31, %v697_v46 }
  0x5b   :  { %v394_v55 = vmul.f32 %v374_v32, %v702_v47  ;;  %440 = vst.msk [vmem:[%s929_s2 + $0x40] sm:$0xff] %vm431_vm1, %v423_v41  ;;  %v345_v52 = vadd.f32 %v329_v43, %v233_v38  ;;  %v218_v54 = vrot.slane %v725_v58, %v642_v22  ;;  %v266_v56 = vrot.slane %v725_v58, %v644_v20 }
  0x5c   :  { %v409_v53 = vadd.f32 %v393_v45, %v281_v40  ;;  %441 = vst.msk [vmem:[%s929_s2 + $0x48] sm:$0xff] %vm431_vm1, %v424_v49  ;;  %v346_v57 = vadd.f32 %v330_v51, %v234_v48  ;;  %v314_v59 = vrot.slane %v725_v58, %v646_v24  ;;  %v378_v60 = vrot.slane %v725_v58, %v648_v27 }
  0x5d   :  { %v410_v25 = vadd.f32 %v394_v55, %v282_v50  ;;  %v235_v61 = vmul.f32 %v218_v54, %v655_v33  ;;  %v283_v62 = vmul.f32 %v266_v56, %v660_v35  ;;  %v236_v63 = vmul.f32 %v218_v54, %v682_v42 }
  0x5e   :  { %v425_v29 = vadd.f32 %v409_v53, %v345_v52  ;;  %v331_v44 = vmul.f32 %v314_v59, %v665_v36  ;;  %v395_v3 = vmul.f32 %v378_v60, %v674_v37  ;;  %v284_v34 = vmul.f32 %v266_v56, %v687_v19 }
  0x5f   :  { %v426_v2 = vadd.f32 %v410_v25, %v346_v57  ;;  %v332_v58 = vmul.f32 %v314_v59, %v697_v46  ;;  %v396_v6 = vmul.f32 %v378_v60, %v702_v47  ;;  %v222_v7 = vrot.slane %v741_v9, %v642_v22 }
  0x60   :  { %442 = vst.msk [vmem:[%s929_s2 + $0x50] sm:$0xff] %vm431_vm1, %v425_v29  ;;  %v270_v8 = vrot.slane %v741_v9, %v644_v20  ;;  %v347_v11 = vadd.f32 %v331_v44, %v235_v61  ;;  %v411_v12 = vadd.f32 %v395_v3, %v283_v62  ;;  %v318_v0 = vrot.slane %v741_v9, %v646_v24 }
  0x61   :  { %443 = vst.msk [vmem:[%s929_s2 + $0x58] sm:$0xff] %vm431_vm1, %v426_v2  ;;  %v382_v1 = vrot.slane %v741_v9, %v648_v27  ;;  %v348_v13 = vadd.f32 %v332_v58, %v236_v63  ;;  %v412_v15 = vadd.f32 %v396_v6, %v284_v34  ;;  %v237_v22 = vmul.f32 %v222_v7, %v655_v33 }
  0x62   :  { %v285_v4 = vmul.f32 %v270_v8, %v660_v35  ;;  %v427_v20 = vadd.f32 %v411_v12, %v347_v11  ;;  %v333_v39 = vmul.f32 %v318_v0, %v665_v36  ;;  %v238_v16 = vmul.f32 %v222_v7, %v682_v42 }
  0x63   :  { %v397_v5 = vmul.f32 %v382_v1, %v674_v37  ;;  %v428_v10 = vadd.f32 %v412_v15, %v348_v13  ;;  %v286_v23 = vmul.f32 %v270_v8, %v687_v19  ;;  %v334_v24 = vmul.f32 %v318_v0, %v697_v46 }
  0x64   :  { %v398_v27 = vmul.f32 %v382_v1, %v702_v47  ;;  %444 = vst.msk [vmem:[%s929_s2 + $0x60] sm:$0xff] %vm431_vm1, %v427_v20  ;;  %v349_v33 = vadd.f32 %v333_v39, %v237_v22 }
  0x65   :  { %v413_v35 = vadd.f32 %v397_v5, %v285_v4  ;;  %445 = vst.msk [vmem:[%s929_s2 + $0x68] sm:$0xff] %vm431_vm1, %v428_v10  ;;  %v350_v36 = vadd.f32 %v334_v24, %v238_v16 }
  0x66   :  { %v414_v37 = vadd.f32 %v398_v27, %v286_v23 }
  0x67   :  { %v429_v42 = vadd.f32 %v413_v35, %v349_v33 }
  0x68   :  { %v430_v19 = vadd.f32 %v414_v37, %v350_v36 }
  0x69   :  { %446 = vst.msk [vmem:[%s929_s2 + $0x70] sm:$0xff] %vm431_vm1, %v429_v42 }
  0x6a   :  { %447 = vst.msk [vmem:[%s929_s2 + $0x78] sm:$0xff] %vm431_vm1, %v430_v19 }
  0x6b   :  { %525 = dma.done.wait [#allocation3], 512  }
  0x6c   :  { %526 = vsyncadd [#allocation3], 4294966784 }
  0x6d   :  { %467 = vsyncpa [#allocation3], 1 }

</bundles_post_ra>
